<compile_context>
chip_gen: v6e
topology: v6e:2x2x1
jax: 0.10.0
libtpu: 0.0.40
codegen_flags: <defaults>
</compile_context>

<pallas_src>
import functools
import math

import jax
import jax.numpy as jnp
from jax.experimental import pallas as pl
from jax.experimental.pallas import tpu as pltpu


def _round_up(x, m):
    return (x + m - 1) // m * m


def _vmem_cap_bytes():
    """Per-core VMEM capacity; conservative 64 MiB (v7x) fallback if unknown."""
    try:
        info = pltpu.get_tpu_info()
        cap = getattr(info, "vmem_capacity_bytes", None)
        if cap:
            return int(cap)
    except Exception:
        pass
    return 64 << 20


# ---------------- fused Pallas kernel ----------------

def _fused_scale_and_b_kernel(label_ref, scale_ref, x_ref, out_ref, b_ref, *, tc, c_total):
    # label_ref: (TM, 1) int32 VMEM      scale_ref: (1,) f32 SMEM
    # x_ref:     (TM, TC) logit block    out_ref:   (TM, TC) in input dtype
    # b_ref:     (TM, 1)  f32 accumulator block (resident across the C grid axis)
    j = pl.program_id(1)
    scale = scale_ref[0]

    x = x_ref[...].astype(jnp.float32) * scale            # (TM, TC) f32
    out_ref[...] = x.astype(out_ref.dtype)                # single write of the bulk output

    # Exclude the target class (and, on ragged edge blocks, out-of-range columns) from the
    # exp-sum.  jnp.where is a select, so inf/NaN from garbage edge data is discarded.
    label_local = label_ref[...] - j * tc                 # (TM, 1), tile-local target col
    cols = jax.lax.broadcasted_iota(jnp.int32, x.shape, 1)
    keep = cols != label_local
    if c_total % tc != 0:                                 # static: only ragged C needs it
        keep = jnp.logical_and(keep, cols < (c_total - j * tc))
    e = jnp.where(keep, jnp.exp(x), 0.0)

    @pl.when(j == 0)
    def _():
        b_ref[...] = jnp.zeros_like(b_ref)

    b_ref[...] += jnp.sum(e, axis=1, keepdims=True)


# ---------------- wrapper ----------------

@functools.partial(
    jax.jit,
    static_argnames=("training", "method_B", "alpha", "block_rows", "block_cols"))
def madacos_forward(logit, label, *, training=True, method_B="default",
                    alpha=0.1, block_rows=512, block_cols=4096):
    assert 0.0 < alpha < 1.0
    assert logit.shape[0] == label.shape[0]
    N, C = logit.shape
    label = label.astype(jnp.int32)

    # ---- per-row target logit: O(N) gather (no full N*C pass) ----
    target_logit = jnp.take_along_axis(
        logit, label[:, None], axis=1)[:, 0].astype(jnp.float32)

    # torch.median(dim=0): lower median and its index in the original order
    order = jnp.argsort(target_logit)
    index = order[(N - 1) // 2]
    logit_median = target_logit[index]

    scale = math.log(9999999.0 * (1.0 - alpha) / alpha) / (1.0 - logit_median)
    scale = jnp.maximum(scale, 32.0).astype(jnp.float32)

    # ---- tiling ----
    itemsize = jnp.dtype(logit.dtype).itemsize
    sublane = max(8, 32 // itemsize)                 # f32: 8, bf16: 16, int8/fp8: 32

    TM = min(_round_up(N, sublane), _round_up(block_rows, sublane))
    # Keep >= 2 row tiles when possible so v7x's two TensorCores both get work.
    if N > sublane and -(-N // TM) < 2:
        TM = _round_up(-(-N // 2), sublane)
    TC = min(_round_up(C, 128), _round_up(block_cols, 128))

    grid = (pl.cdiv(N, TM), pl.cdiv(C, TC))          # ragged edges masked in-kernel

    out_dtype = logit.dtype                          # write output in the input dtype
    block_bytes = TM * TC * (itemsize + jnp.dtype(out_dtype).itemsize) \
        + 2 * TM * 128 * 4                           # label + B blocks (lane-padded)
    vmem_limit = int(min(max(2 * block_bytes + (4 << 20), 32 << 20),
                         _vmem_cap_bytes() - (8 << 20)))

    label2d = label.reshape(N, 1)

    out_scaled, B2d = pl.pallas_call(
        functools.partial(_fused_scale_and_b_kernel, tc=TC, c_total=C),
        out_shape=(jax.ShapeDtypeStruct((N, C), out_dtype),
                   jax.ShapeDtypeStruct((N, 1), jnp.float32)),
        grid=grid,
        in_specs=[pl.BlockSpec((TM, 1), lambda i, j: (i, 0)),
                  pl.BlockSpec(memory_space=pltpu.MemorySpace.SMEM),
                  pl.BlockSpec((TM, TC), lambda i, j: (i, j))],
        out_specs=(pl.BlockSpec((TM, TC), lambda i, j: (i, j)),
                   pl.BlockSpec((TM, 1), lambda i, j: (i, 0))),
        compiler_params=pltpu.CompilerParams(
            dimension_semantics=("parallel", "arbitrary"),
            vmem_limit_bytes=vmem_limit),
    )(label2d, scale.reshape(1), logit)

    B = B2d[:, 0]

    if method_B == "median":
        B_avg = jnp.sort(B)[(N - 1) // 2]            # torch lower median
    elif method_B == "mean":
        B_avg = jnp.mean(B)
    else:
        B_avg = B[index]

    margin = logit_median - jnp.log(B_avg * alpha / (1.0 - alpha)) / scale
    if training:
        margin = jnp.maximum(margin, 0.0)
    else:
        margin = jnp.zeros_like(margin)
    margin = margin.astype(jnp.float32)

    # ---- O(N) margin fix-up at (i, label[i]); in-place scatter under jit ----
    updates = jnp.broadcast_to((-(scale * margin)).astype(out_scaled.dtype), (N,))
    out = out_scaled.at[jnp.arange(N), label].add(
        updates, indices_are_sorted=True, unique_indices=True)

    return (out,
            margin.reshape(1),
            scale.reshape(1),
            logit_median.reshape(1),
            B_avg.reshape(1))


class MadaCosLayer:
    """JAX/Pallas port of the PyTorch MadaCosLayer (forward only)."""

    def __init__(self, method_B="default", alpha=0.1, training=True):
        self.method_B = method_B
        self.alpha = alpha
        self.training = training

    def __call__(self, logit, label):
        return madacos_forward(logit, label, training=self.training,
                               method_B=self.method_B, alpha=self.alpha)


# ---------------- pure-JAX reference (sanity check) ----------------

def _reference(logit, label, training=True, method_B="default", alpha=0.1):
    logit = logit.astype(jnp.float32)
    N, C = logit.shape
    onehot = jax.nn.one_hot(label, C, dtype=jnp.float32)
    target = jnp.sum(jnp.where(onehot > 0, logit, 0.0), axis=1)
    order = jnp.argsort(target)
    idx = order[(N - 1) // 2]
    med = target[idx]
    scale = math.log(9999999 * (1.0 - alpha) / alpha) / (1.0 - med)
    scale = jnp.where(scale < 32.0, jnp.float32(32.0), scale)
    B = jnp.sum(jnp.where(onehot < 1, jnp.exp(logit * scale), 0.0), axis=1)
    if method_B == "median":
        B_avg = jnp.sort(B)[(N - 1) // 2]
    elif method_B == "mean":
        B_avg = jnp.mean(B)
    else:
        B_avg = B[idx]
    margin = med - jnp.log(B_avg * alpha / (1.0 - alpha)) / scale
    margin = jnp.where(margin < 0.0, 0.0, margin) if training else jnp.float32(0.0)
    out = logit * scale - jnp.where(onehot > 0, scale * margin, 0.0)
    return out, margin, scale, med, B_avg


if __name__ == "__main__":
    root = jax.random.PRNGKey(0)

    def check(logit, label, training=True, method_B="default",
              out_rtol=1e-4, out_atol=1e-4, **tile_kw):
        out, margin, scale, med, b_avg = madacos_forward(
            logit, label, training=training, method_B=method_B, **tile_kw)
        jax.block_until_ready(out)
        r_out, r_margin, r_scale, r_med, r_bavg = _reference(
            logit, label, training=training, method_B=method_B)
        assert jnp.allclose(out.astype(jnp.float32), r_out,
                            rtol=out_rtol, atol=out_atol)
        assert jnp.allclose(margin[0], r_margin, rtol=1e-4, atol=1e-5)
        assert jnp.allclose(scale[0], r_scale, rtol=1e-5)
        assert jnp.allclose(med[0], r_med, rtol=1e-5)
        assert jnp.allclose(b_avg[0], r_bavg, rtol=1e-3)
        return out, margin

    # case 1: confident targets -> non-zero margin path; 2 row tiles (parallel axis split);
    #         also exercised through the MadaCosLayer class wrapper.
    k1, k2, k3 = jax.random.split(jax.random.fold_in(root, 1), 3)
    n, c = 64, 512
    logit1 = jax.random.uniform(k1, (n, c), jnp.float32, minval=-1.0, maxval=-0.5)
    label1 = jax.random.randint(k2, (n,), 0, c, dtype=jnp.int32)
    tgt = jax.random.uniform(k3, (n,), jnp.float32, minval=0.6, maxval=0.8)
    logit1 = logit1.at[jnp.arange(n), label1].set(tgt)
    out1, margin1 = check(logit1, label1)
    assert float(margin1[0]) > 0.0
    layer_out = MadaCosLayer()(logit1, label1)[0]
    assert jnp.allclose(layer_out, out1)

    # case 2: multi-block grid (2 row tiles x 3 column tiles) -> B accumulator revisits
    k1, k2 = jax.random.split(jax.random.fold_in(root, 2))
    logit2 = jax.random.uniform(k1, (32, 384), jnp.float32, minval=-1.0, maxval=1.0)
    label2 = jax.random.randint(k2, (32,), 0, 384, dtype=jnp.int32)
    check(logit2, label2, method_B="median", block_rows=16, block_cols=128)

    # case 3: ragged shapes (no pad/slice copies; edge blocks masked inside the kernel)
    k1, k2 = jax.random.split(jax.random.fold_in(root, 3))
    logit3 = jax.random.uniform(k1, (10, 200), jnp.float32, minval=-1.0, maxval=1.0)
    label3 = jax.random.randint(k2, (10,), 0, 200, dtype=jnp.int32)
    check(logit3, label3, method_B="mean")

    # case 4: bf16 input -> bf16 output path (f32 internal accumulation), looser out tol
    k1, k2 = jax.random.split(jax.random.fold_in(root, 4))
    logit4 = jax.random.uniform(
        k1, (48, 384), jnp.float32, minval=-1.0, maxval=1.0).astype(jnp.bfloat16)
    label4 = jax.random.randint(k2, (48,), 0, 384, dtype=jnp.int32)
    out4, _ = check(logit4, label4, out_rtol=5e-2, out_atol=1.0)
    assert out4.dtype == jnp.bfloat16

    print("KERNEL_OK")
</pallas_src>

<mosaic_0001>
module attributes {stable_mosaic.version = 11 : i64} {
  func.func private @main(%arg0: i32) attributes {dimension_semantics = [#tpu.dimension_semantics<core_parallel>], iteration_bounds = array<i64: 2>, tpu.core_type = #tpu.core_type<sc_scalar_subcore>, window_params = []} {
    return
  }
}

module attributes {stable_mosaic.version = 11 : i64} {
  func.func private @main(%arg0: i32) attributes {dimension_semantics = [#tpu.dimension_semantics<core_parallel>], iteration_bounds = array<i64: 2>, tpu.core_type = #tpu.core_type<sc_scalar_subcore>, window_params = []} {
    return
  }
}

module attributes {stable_mosaic.version = 11 : i64} {
  func.func @_fused_scale_and_b_kernel(%arg0: i32, %arg1: i32, %arg2: memref<32x1xi32, #tpu.memory_space<vmem>>, %arg3: memref<1xf32, #tpu.memory_space<smem>>, %arg4: memref<32x512xf32, #tpu.memory_space<vmem>>, %arg5: memref<32x512xf32, #tpu.memory_space<vmem>>, %arg6: memref<32x1xf32, #tpu.memory_space<vmem>>) attributes {dimension_semantics = [#tpu.dimension_semantics<parallel>, #tpu.dimension_semantics<arbitrary>], iteration_bounds = array<i64: 2, 1>, scalar_prefetch = 0 : i64, scratch_operands = 0 : i64, tpu.core_type = #tpu.core_type<tc>, window_params = [{transform_indices = @transform_0, window_bounds = array<i64: 32, 1>}, {transform_indices = @transform_1, window_bounds = array<i64: 1>}, {transform_indices = @transform_2, window_bounds = array<i64: 32, 512>}, {transform_indices = @transform_3, window_bounds = array<i64: 32, 512>}, {transform_indices = @transform_4, window_bounds = array<i64: 32, 1>}]} {
    %c0 = arith.constant 0 : index
    %0 = memref.load %arg3[%c0] : memref<1xf32, #tpu.memory_space<smem>>
    %c0_0 = arith.constant 0 : index
    %c0_1 = arith.constant 0 : index
    %1 = vector.load %arg4[%c0_0, %c0_1] : memref<32x512xf32, #tpu.memory_space<vmem>>, vector<32x512xf32>
    %2 = vector.broadcast %0 : f32 to vector<32x512xf32>
    %3 = arith.mulf %1, %2 : vector<32x512xf32>
    %c0_2 = arith.constant 0 : index
    %c0_3 = arith.constant 0 : index
    %4 = vector.load %arg5[%c0_2, %c0_3] : memref<32x512xf32, #tpu.memory_space<vmem>>, vector<32x512xf32>
    tpu.vector_store %arg5[%c0_2, %c0_3], %3 {strides = array<i32>} : memref<32x512xf32, #tpu.memory_space<vmem>>, vector<32x512xf32>,
    %c0_4 = arith.constant 0 : index
    %c0_5 = arith.constant 0 : index
    %5 = vector.load %arg2[%c0_4, %c0_5] : memref<32x1xi32, #tpu.memory_space<vmem>>, vector<32x1xi32>
    %c512_i32 = arith.constant 512 : i32
    %6 = arith.muli %arg1, %c512_i32 : i32
    %7 = vector.broadcast %6 : i32 to vector<32x1xi32>
    %8 = arith.subi %5, %7 : vector<32x1xi32>
    %9 = tpu.iota {dimensions = array<i32: 1>} : vector<32x512xi32>
    %10 = vector.broadcast %8 : vector<32x1xi32> to vector<32x512xi32>
    %11 = arith.cmpi ne, %9, %10 : vector<32x512xi32>
    %12 = math.exp %3 : vector<32x512xf32>
    %cst = arith.constant 0.000000e+00 : f32
    %13 = vector.broadcast %cst : f32 to vector<32x512xf32>
    %14 = arith.select %11, %12, %13 : vector<32x512xi1>, vector<32x512xf32>
    %c0_i32 = arith.constant 0 : i32
    %15 = arith.cmpi eq, %arg1, %c0_i32 : i32
    %16 = arith.extui %15 : i1 to i32
    %c0_i32_6 = arith.constant 0 : i32
    %17 = arith.cmpi ne, %16, %c0_i32_6 : i32
    scf.if %17 {
      %cst_12 = arith.constant 0.000000e+00 : f32
      %23 = vector.broadcast %cst_12 : f32 to vector<32x1xf32>
      %c0_13 = arith.constant 0 : index
      %c0_14 = arith.constant 0 : index
      %24 = vector.load %arg6[%c0_13, %c0_14] : memref<32x1xf32, #tpu.memory_space<vmem>>, vector<32x1xf32>
      tpu.vector_store %arg6[%c0_13, %c0_14], %23 {strides = array<i32>} : memref<32x1xf32, #tpu.memory_space<vmem>>, vector<32x1xf32>,
    } else {
    }
    %c0_7 = arith.constant 0 : index
    %c0_8 = arith.constant 0 : index
    %18 = vector.load %arg6[%c0_7, %c0_8] : memref<32x1xf32, #tpu.memory_space<vmem>>, vector<32x1xf32>
    %cst_9 = arith.constant dense<0.000000e+00> : vector<32xf32>
    %19 = vector.multi_reduction <add>, %14, %cst_9 [1] : vector<32x512xf32> to vector<32xf32>
    %20 = vector.shape_cast %19 : vector<32xf32> to vector<32x1xf32>
    %21 = arith.addf %18, %20 : vector<32x1xf32>
    %c0_10 = arith.constant 0 : index
    %c0_11 = arith.constant 0 : index
    %22 = vector.load %arg6[%c0_10, %c0_11] : memref<32x1xf32, #tpu.memory_space<vmem>>, vector<32x1xf32>
    tpu.vector_store %arg6[%c0_10, %c0_11], %21 {strides = array<i32>} : memref<32x1xf32, #tpu.memory_space<vmem>>, vector<32x1xf32>,
    return
  }
  func.func @transform_0(%arg0: i32, %arg1: i32) -> (i32, i32) {
    %c0_i32 = arith.constant 0 : i32
    %c0_i32_0 = arith.constant 0 : i32
    return %arg0, %c0_i32 : i32, i32
  }
  func.func @transform_1(%arg0: i32, %arg1: i32) -> i32 {
    %c0_i32 = arith.constant 0 : i32
    %c0_i32_0 = arith.constant 0 : i32
    return %c0_i32 : i32
  }
  func.func @transform_2(%arg0: i32, %arg1: i32) -> (i32, i32) {
    %c0_i32 = arith.constant 0 : i32
    return %arg0, %arg1 : i32, i32
  }
  func.func @transform_3(%arg0: i32, %arg1: i32) -> (i32, i32) {
    %c0_i32 = arith.constant 0 : i32
    return %arg0, %arg1 : i32, i32
  }
  func.func @transform_4(%arg0: i32, %arg1: i32) -> (i32, i32) {
    %c0_i32 = arith.constant 0 : i32
    %c0_i32_0 = arith.constant 0 : i32
    return %arg0, %c0_i32 : i32, i32
  }
}

</mosaic_0001>

<bundles_post_ra>
// kernel: madacos_forward.1
= control target key start
LH: loop header
LB: loop body
LE: loop exit
PB: predicated region body
PF: predicated region fallthrough
CT: control target
= control target key end

     0   :  { %s1016_s0 = inlined_call_operand.vmem [shape: s32[64,1], index: 0, kind: input, shape index: {}]   ;;  %s1017_s1 = inlined_call_operand.<no memory space> [shape: f32[1], index: 1, kind: input, shape index: {}]   ;;  %s1018_s2 = inlined_call_operand.vmem [shape: f32[64,512], index: 2, kind: input, shape index: {}]   ;;  %s1019_s3 = inlined_call_operand.hbm [shape: f32[64,512], index: 3, kind: output, shape index: {0}]   ;;  %s1020_s4 = inlined_call_operand.vmem [shape: f32[64,1], index: 4, kind: output, shape index: {1}]  }
   0x1   :  { %10 = sst [smem:[#allocation2]] %s1017_s1 }
   0x2   :  { %11 = vsyncpa [#allocation4], 0 }
   0x3   :  { %13 = vsyncpa [#allocation4 + $0x1], 0  ;;  %s821_s17 = smov 0   ;;  %s823_s18 = smov 0  }
   0x4   :  { %s825_s19 = smov 0   ;;  %s827_s20 = smov 0  }
   0x5   :  { %s829_s21 = smov 0   ;;  %s831_s22 = smov 0  }
   0x6 LB: > { %s595_s1 = sadd.s32 4294967295, %s786_s22   ;;  %s596_s23 = sadd.s32 4294967294, %s786_s22   ;;  %s786_s22 = sphi %s831_s22, %s19_s22   ;;  %s782_s21 = sphi %s829_s21, %s1027_s21   ;;  %s778_s20 = sphi %s827_s20, %s1026_s20   ;;  %s774_s19 = sphi %s825_s19, %s1025_s19   ;;  %s770_s18 = sphi %s823_s18, %s1024_s18   ;;  %s766_s17 = sphi %s821_s17, %s1023_s17  }
   0x7   : > { %s31_s24 = sadd.s32 1, %s782_s21  ;;  %s115_s25 = sadd.s32 1, %s774_s19 }
   0x8   : > { %p33_p0 = scmp.ge.s32.totalorder %s31_s24, 2  ;;  %p125_p1 = scmp.ne.s32.totalorder %s774_s19, %s770_s18 }
   0x9   : > { %p126_p2 = scmp.eq.s32.totalorder %s595_s1, 1  ;;  %p131_p3 = scmp.ne.s32.totalorder %s770_s18, %s766_s17 }
   0xa   : > { %s1029_s24 = smov (%p33_p0, %s31_s24), 0  ;;  %p132_p5 = scmp.eq.s32.totalorder %s596_s23, 1 }
   0xb   : > { %p861_p4 = por %p126_p2, %p125_p1  ;;  %s110_s27 = ssub.s32 %s782_s21, %s1029_s24 }
   0xc   : > { %p599_p6 = scmp.ge.s32.totalorder %s786_s22, 1  ;;  %p113_p7 = scmp.eq.s32.totalorder %s110_s27, 0 }
   0xd   : > { %p868_p8 = por %p132_p5, %p131_p3  ;;  %p203_p9 = scmp.lt.s32.totalorder %s786_s22, 3 }
   0xe   : > { %s874_s29 = scalar_select %p113_p7, %s774_s19, %s115_s25  }
   0xf   : > { %p204_p10 = pnand %p599_p6, %p203_p9 }
  0x10   : > { %s601_s30 = sshll.u32 (!%p204_p10), %s778_s20, 2  ;;  %s270_s5 = sld [smem:[#allocation2]] (!%p204_p10) }
  0x11   : > { %207 = sbr.rel (%p204_p10) target bundleno = 308 (0x134), region = 32  ;;  %p245_p11 = scmp.lt.s32.totalorder (!%p204_p10), %s601_s30, 7 }
  0x12   : > { %s234_s14 = sand.u32 (!%p204_p10), 1, %s770_s18   ;;  %s616_s27 = sshll.u32 (!%p204_p10), %s778_s20, 11 }
  0x13   : > { %s600_s15 = sshll.u32 (!%p204_p10), %s234_s14, 7  ;;  %s959_s8 = scalar_lea.sflag (!%p204_p10), [#allocation4], %s234_s14 }
  0x14   : > { %s910_s16 = scalar_lea.vmem (!%p204_p10), [#allocation3], %s600_s15  ;;  %s790_s20 = smov (!%p204_p10), [#allocation3]  }
  0x16   : > { %v788_v0 = vmov 0   ;;  %s1031_s30 = smov (!%p245_p11, %s601_s30), 7  ;;  %v287_v9 = vstv %s270_s5  ;;  %vm415_vm0 = vcmask 7168   ;;  %v789_v38 = vmov 0.0  }
  0x17   : > { %677 = vset.pattern.permute.xlu1 %v788_v0  ;;  %676 = vset.pattern.permute.xlu0 %v788_v0  ;;  %s602_s6 = sshll.u32 %s1031_s30, 3  ;;  %s614_s7 = sshll.u32 %s1031_s30, 5  ;;  %v330_v51 = vlaneseq }
  0x18   : > { %s248_s10 = scalar_lea.vmem %s1016_s0, %s602_s6  ;;  %s889_s13 = scalar_lea.vmem %s1018_s2, %s614_s7 }
  0x19   : > { %v322_v1 = vld [vmem:[%s248_s10 + $0x10] sm:$0xff]  ;;  %v320_v2 = vld [vmem:[%s248_s10] sm:$0xff]  ;;  %v323_v3 = vld [vmem:[%s248_s10 + $0x18] sm:$0xff]  ;;  %s931_s25 = scalar_lea.vmem %s1020_s4, %s602_s6  ;;  %v331_v55 = vand.u32 127, %v330_v51  ;;  %s475_s30 = sshll.u32 %s910_s16, 4  ;;  %s955_s30 = int_to_ptr.vmem [resolvable:$true] %s475_s30 }
  0x1a   : > { %342 = vperm.xlu1 %677, %v322_v1   ;;  %336 = vperm.xlu0 %676, %v320_v2   ;;  %v321_v4 = vld [vmem:[%s248_s10 + $0x8] sm:$0xff]  ;;  %v271_v5 = vld [vmem:[%s889_s13] sm:$0xff]  ;;  %v273_v7 = vld [vmem:[%s889_s13 + $0x10] sm:$0xff]  ;;  %416 = vst.msk [vmem:[%s931_s25] sm:$0xff] %vm415_vm0, %v789_v38  ;;  %s953_s7 = scalar_lea.hbm %s1019_s3, %s616_s27  ;;  %s710_s9 = scalar_lea.vmem %s955_s30, 2048 }
  0x1b   : > { %v272_v6 = vld [vmem:[%s889_s13 + $0x8] sm:$0xff]  ;;  %v274_v8 = vld [vmem:[%s889_s13 + $0x18] sm:$0xff]  ;;  %v279_v10 = vld [vmem:[%s889_s13 + $0x40] sm:$0xff]  ;;  %v288_v16 = vmul.f32 %v287_v9, %v271_v5  ;;  %v290_v18 = vmul.f32 %v287_v9, %v273_v7  ;;  %417 = vst.msk [vmem:[%s931_s25 + $0x8] sm:$0xff] %vm415_vm0, %v789_v38  ;;  %v332_v61 = vadd.s32 128, %v331_v55  ;;  %v333_v63 = vadd.s32 256, %v331_v55  ;;  %p711_p12 = scmp.ne.s32.totalorder %s955_s30, %s710_s9 }
  0x1c   : > { %v280_v11 = vld [vmem:[%s889_s13 + $0x48] sm:$0xff]  ;;  %v281_v12 = vld [vmem:[%s889_s13 + $0x50] sm:$0xff]  ;;  %v282_v13 = vld [vmem:[%s889_s13 + $0x58] sm:$0xff]  ;;  %v289_v17 = vmul.f32 %v287_v9, %v272_v6  ;;  %v291_v19 = vmul.f32 %v287_v9, %v274_v8  ;;  %v296_v20 = vmul.f32 %v287_v9, %v279_v10  ;;  %418 = vst.msk [vmem:[%s931_s25 + $0x10] sm:$0xff] %vm415_vm0, %v789_v38  ;;  %v334_v1 = vadd.s32 384, %v331_v55  ;;  %s714_s10 = sshll.u32 %s790_s20, 4  ;;  %s715_s10 = int_to_ptr.vmem [resolvable:$false] %s714_s10 }
  0x1d   : > { %v275_v14 = vld [vmem:[%s889_s13 + $0x20] sm:$0xff]  ;;  %v276_v15 = vld [vmem:[%s889_s13 + $0x28] sm:$0xff]  ;;  %v297_v21 = vmul.f32 %v287_v9, %v280_v11  ;;  %v298_v22 = vmul.f32 %v287_v9, %v281_v12  ;;  %v277_v23 = vld [vmem:[%s889_s13 + $0x30] sm:$0xff]  ;;  %v299_v24 = vmul.f32 %v287_v9, %v282_v13  ;;  %304 = vst [vmem:[%s910_s16] sm:$0xff] %v288_v16  ;;  %v363_v39 = vmul.f32 1.442695, %v288_v16  ;;  %p712_p13 = pnand %p711_p12, %p861_p4  ;;  %s716_s11 = scalar_lea.vmem %s715_s10, 4096 }
  0x1e   : > { %345 = vperm.xlu1 %677, %v323_v3   ;;  %339 = vperm.xlu0 %676, %v321_v4   ;;  %v278_v25 = vld [vmem:[%s889_s13 + $0x38] sm:$0xff]  ;;  %v292_v26 = vmul.f32 %v287_v9, %v275_v14  ;;  %v293_v27 = vmul.f32 %v287_v9, %v276_v15  ;;  %v294_v28 = vmul.f32 %v287_v9, %v277_v23  ;;  %v283_v29 = vld [vmem:[%s889_s13 + $0x60] sm:$0xff]  ;;  %v284_v31 = vld [vmem:[%s889_s13 + $0x68] sm:$0xff]  ;;  %v365_v40 = vmul.f32 1.442695, %v289_v17  ;;  %p717_p1 = scmp.lt.s32.totalorder %s955_s30, %s715_s10  ;;  %p718_p2 = scmp.lt.s32.totalorder %s716_s11, %s710_s9 }
  0x1f   : > { %v295_v30 = vmul.f32 %v287_v9, %v278_v25  ;;  %v285_v32 = vld [vmem:[%s889_s13 + $0x70] sm:$0xff]  ;;  %v286_v33 = vld [vmem:[%s889_s13 + $0x78] sm:$0xff]  ;;  %v300_v34 = vmul.f32 %v287_v9, %v283_v29  ;;  %305 = vst [vmem:[%s910_s16 + $0x8] sm:$0xff] %v289_v17  ;;  %306 = vst [vmem:[%s910_s16 + $0x10] sm:$0xff] %v290_v18  ;;  %v301_v35 = vmul.f32 %v287_v9, %v284_v31  ;;  %v367_v41 = vmul.f32 1.442695, %v290_v18  ;;  %p713_p0 = pneg %p712_p13 }
  0x20   : > { %307 = vst [vmem:[%s910_s16 + $0x18] sm:$0xff] %v291_v19  ;;  %312 = vst [vmem:[%s910_s16 + $0x40] sm:$0xff] %v296_v20  ;;  %v302_v36 = vmul.f32 %v287_v9, %v285_v32  ;;  %v303_v37 = vmul.f32 %v287_v9, %v286_v33  ;;  %v369_v42 = vmul.f32 1.442695, %v291_v19  ;;  %678 = vpow2.f32 %v363_v39  ;;  %p719_p3 = por %p718_p2, %p717_p1 }
  0x21   : > { %313 = vst [vmem:[%s910_s16 + $0x48] sm:$0xff] %v297_v21  ;;  %314 = vst [vmem:[%s910_s16 + $0x50] sm:$0xff] %v298_v22  ;;  %v379_v43 = vmul.f32 1.442695, %v296_v20  ;;  %680 = vpow2.f32 %v365_v40  ;;  %v381_v44 = vmul.f32 1.442695, %v297_v21 }
  0x22   : > { %315 = vst [vmem:[%s910_s16 + $0x58] sm:$0xff] %v299_v24  ;;  %308 = vst [vmem:[%s910_s16 + $0x20] sm:$0xff] %v292_v26  ;;  %682 = vpow2.f32 %v367_v41  ;;  %v383_v45 = vmul.f32 1.442695, %v298_v22  ;;  %v385_v46 = vmul.f32 1.442695, %v299_v24  ;;  %p720_p5 = pnand %p719_p3, %p713_p0 }
  0x23   : > { %309 = vst [vmem:[%s910_s16 + $0x28] sm:$0xff] %v293_v27  ;;  %310 = vst [vmem:[%s910_s16 + $0x30] sm:$0xff] %v294_v28  ;;  %684 = vpow2.f32 %v369_v42  ;;  %v371_v47 = vmul.f32 1.442695, %v292_v26  ;;  %v373_v48 = vmul.f32 1.442695, %v293_v27 }
  0x24   : > { %311 = vst [vmem:[%s910_s16 + $0x38] sm:$0xff] %v295_v30  ;;  %316 = vst [vmem:[%s910_s16 + $0x60] sm:$0xff] %v300_v34  ;;  %686 = vpow2.f32 %v379_v43  ;;  %v375_v49 = vmul.f32 1.442695, %v294_v28  ;;  %v387_v50 = vmul.f32 1.442695, %v300_v34 }
  0x25   : > { %317 = vst [vmem:[%s910_s16 + $0x68] sm:$0xff] %v301_v35  ;;  %318 = vst [vmem:[%s910_s16 + $0x70] sm:$0xff] %v302_v36  ;;  %688 = vpow2.f32 %v381_v44  ;;  %v389_v52 = vmul.f32 1.442695, %v301_v35  ;;  %v377_v53 = vmul.f32 1.442695, %v295_v30 }
  0x26   : > { %319 = vst [vmem:[%s910_s16 + $0x78] sm:$0xff] %v303_v37  ;;  %419 = vst.msk [vmem:[%s931_s25 + $0x18] sm:$0xff] %vm415_vm0, %v789_v38  ;;  %690 = vpow2.f32 %v383_v45  ;;  %v391_v54 = vmul.f32 1.442695, %v302_v36  ;;  %v393_v57 = vmul.f32 1.442695, %v303_v37 }
  0x27   : > { %692 = vpow2.f32 %v385_v46 }
  0x28   : > { %694 = vpow2.f32 %v371_v47 }
  0x29   : > { %696 = vpow2.f32 %v373_v48 }
  0x2a   : > { %698 = vpow2.f32 %v375_v49 }
  0x2b   : > { %700 = vpow2.f32 %v387_v50 }
  0x2c   : > { %702 = vpow2.f32 %v389_v52 }
  0x2d   : > { %v679_v56 = vpop.eup %678  ;;  %704 = vpow2.f32 %v377_v53 }
  0x2e   : > { %v681_v58 = vpop.eup %680  ;;  %706 = vpow2.f32 %v391_v54 }
  0x2f   : > { %v683_v59 = vpop.eup %682  ;;  %708 = vpow2.f32 %v393_v57 }
  0x30   : > { %v685_v60 = vpop.eup %684 }
  0x31   : > { %v687_v62 = vpop.eup %686 }
  0x32   : > { %v689_v0 = vpop.eup %688 }
  0x33   : > { %v691_v2 = vpop.eup %690 }
  0x34   : > { %v693_v5 = vpop.eup %692 }
  0x35   : > { %v695_v6 = vpop.eup %694 }
  0x36   : > { %v697_v9 = vpop.eup %696 }
  0x37   : > { %v699_v11 = vpop.eup %698 }
  0x38   : > { %v701_v17 = vpop.eup %700 }
  0x39   : > { %v703_v19 = vpop.eup %702 }
  0x3a   : > { %v705_v26 = vpop.eup %704 }
  0x3b   : > { %v707_v30 = vpop.eup %706 }
  0x3c   : > { %v709_v36 = vpop.eup %708 }
  0x95   : > { %v343_v3 = vpop.permute.xlu1 %342  ;;  %v337_v4 = vpop.permute.xlu0 %336 }
  0x96   : > { %vm355_vm1 = vcmp.ne.s32.totalorder %v331_v55, %v343_v3  ;;  %vm356_vm2 = vcmp.ne.s32.totalorder %v332_v61, %v343_v3  ;;  %vm347_vm3 = vcmp.ne.s32.totalorder %v331_v55, %v337_v4  ;;  %vm348_vm4 = vcmp.ne.s32.totalorder %v332_v61, %v337_v4 }
  0x97   : > { %vm349_vm5 = vcmp.ne.s32.totalorder %v333_v63, %v337_v4  ;;  %v395_v7 = vsel %vm347_vm3, %v679_v56, 0.0  ;;  %v396_v8 = vsel %vm348_vm4, %v681_v58, 0.0  ;;  %vm350_vm6 = vcmp.ne.s32.totalorder %v334_v1, %v337_v4 }
  0x98   : > { %v424_v10 = vadd.f32 %v396_v8, %v395_v7  ;;  %vm357_vm7 = vcmp.ne.s32.totalorder %v333_v63, %v343_v3  ;;  %v397_v14 = vsel %vm349_vm5, %v683_v59, 0.0  ;;  %vm358_vm8 = vcmp.ne.s32.totalorder %v334_v1, %v343_v3 }
  0x99   : > { %v346_v12 = vpop.permute.xlu1 %345  ;;  %v340_v13 = vpop.permute.xlu0 %339  ;;  %v403_v15 = vsel %vm355_vm1, %v687_v62, 0.0  ;;  %v404_v16 = vsel %vm356_vm2, %v689_v0, 0.0  ;;  %v405_v18 = vsel %vm357_vm7, %v691_v2, 0.0  ;;  %v398_v22 = vsel %vm350_vm6, %v685_v60, 0.0 }
  0x9a   : > { %vm359_vm9 = vcmp.ne.s32.totalorder %v331_v55, %v346_v12  ;;  %vm351_vm10 = vcmp.ne.s32.totalorder %v331_v55, %v340_v13  ;;  %vm352_vm11 = vcmp.ne.s32.totalorder %v332_v61, %v340_v13  ;;  %vm360_vm12 = vcmp.ne.s32.totalorder %v332_v61, %v346_v12 }
  0x9b   : > { %v425_v20 = vadd.f32 %v424_v10, %v397_v14  ;;  %v434_v21 = vadd.f32 %v404_v16, %v403_v15  ;;  %vm353_vm13 = vcmp.ne.s32.totalorder %v333_v63, %v340_v13  ;;  %v406_v23 = vsel %vm358_vm8, %v693_v5, 0.0 }
  0x9c   : > { %v399_v24 = vsel %vm351_vm10, %v695_v6, 0.0  ;;  %v400_v25 = vsel %vm352_vm11, %v697_v9, 0.0  ;;  %vm354_vm14 = vcmp.ne.s32.totalorder %v334_v1, %v340_v13  ;;  %v401_v31 = vsel %vm353_vm13, %v699_v11, 0.0 }
  0x9d   : > { %v426_v27 = vadd.f32 %v425_v20, %v398_v22  ;;  %v435_v28 = vadd.f32 %v434_v21, %v405_v18  ;;  %v429_v29 = vadd.f32 %v400_v25, %v399_v24  ;;  %vm361_vm15 = vcmp.ne.s32.totalorder %v333_v63, %v346_v12 }
  0x9e   : > { %v407_v32 = vsel %vm359_vm9, %v701_v17, 0.0  ;;  %v408_v33 = vsel %vm360_vm12, %v703_v19, 0.0  ;;  %v402_v37 = vsel %vm354_vm14, %v705_v26, 0.0  ;;  %vm362_vm1 = vcmp.ne.s32.totalorder %v334_v1, %v346_v12 }
  0x9f   : > { %427 = vadd.xlane.f32.xlu0 %v426_v27  ;;  %v436_v34 = vadd.f32 %v435_v28, %v406_v23  ;;  %v430_v35 = vadd.f32 %v429_v29, %v401_v31  ;;  %v439_v38 = vadd.f32 %v408_v33, %v407_v32  ;;  %v409_v40 = vsel %vm361_vm15, %v707_v30, 0.0 }
  0xa0   : > { %v410_v42 = vsel %vm362_vm1, %v709_v36, 0.0 }
  0xa1   : > { %v431_v39 = vadd.f32 %v430_v35, %v402_v37  ;;  %v440_v41 = vadd.f32 %v439_v38, %v409_v40 }
  0xa3   : > { %437 = vadd.xlane.f32.xlu0 %v436_v34  ;;  %432 = vadd.xlane.f32.xlu1 %v431_v39  ;;  %v441_v43 = vadd.f32 %v440_v41, %v410_v42 }
  0xa7   : > { %442 = vadd.xlane.f32.xlu0 %v441_v43 }
  0xa8   : > { %723 = shalt.err (!%p720_p5)
}
  0xa9   : > { %s724_s12 = scalar_lea.hbm %s953_s7, 2048  ;;  %s728_s15 = scalar_lea.hbm %s1019_s3, 4096 }
  0xaa   : > { %p725_p6 = scmp.ne.s32.totalorder %s953_s7, %s724_s12  ;;  %p729_p10 = scmp.lt.s32.totalorder %s953_s7, %s1019_s3 }
  0xab   : > { %p730_p11 = scmp.lt.s32.totalorder %s728_s15, %s724_s12 }
  0xac   : > { %p726_p7 = pnand %p725_p6, %p861_p4 }
  0xad   : > { %p731_p12 = por %p730_p11, %p729_p10 }
  0xae   : > { %p727_p9 = pneg %p726_p7 }
  0xb0   : > { %p732_p13 = pnand %p731_p12, %p727_p9 }
  0xb2   : > { %735 = shalt.err (!%p732_p13)
}
  0xb3   : > { %s791_s23 = smov 512   ;;  %s792_s27 = smov 32   ;;  %v420_v44 = vld [vmem:[%s931_s25] sm:$0xff]  ;;  %v421_v46 = vld [vmem:[%s931_s25 + $0x8] sm:$0xff]  ;;  %v422_v47 = vld [vmem:[%s931_s25 + $0x10] sm:$0xff] }
  0xb4   : > { %617 = dma.vmem_to_hbm [thread:$0]  (%p861_p4), %s955_s30, 2048, %s953_s7, %s959_s8, %s791_s23, %s791_s23, %s792_s27  }
  0xb5   : > { %v423_v48 = vld [vmem:[%s931_s25 + $0x18] sm:$0xff] }
 0x128   : > { %v428_v45 = vpop.xlane.xlu0 %427 }
 0x129   : > { %v444_v49 = vadd.f32 %v428_v45, %v420_v44 }
 0x12b   : > { %449 = vst.msk [vmem:[%s931_s25] sm:$0xff] %vm415_vm0, %v444_v49 }
 0x12c   : > { %v433_v50 = vpop.xlane.xlu1 %432  ;;  %v438_v51 = vpop.xlane.xlu0 %437 }
 0x12d   : > { %v445_v52 = vadd.f32 %v433_v50, %v421_v46  ;;  %v446_v53 = vadd.f32 %v438_v51, %v422_v47 }
 0x12f   : > { %450 = vst.msk [vmem:[%s931_s25 + $0x8] sm:$0xff] %vm415_vm0, %v445_v52  ;;  %451 = vst.msk [vmem:[%s931_s25 + $0x10] sm:$0xff] %vm415_vm0, %v446_v53 }
 0x130   : > { %v443_v54 = vpop.xlane.xlu0 %442 }
 0x131   : > { %v447_v55 = vadd.f32 %v443_v54, %v423_v48 }
 0x133   : > { %452 = vst.msk [vmem:[%s931_s25 + $0x18] sm:$0xff] %vm415_vm0, %v447_v55 }
 0x134 PF: > { %p623_p4 = scmp.ge.s32.totalorder %s786_s22, 2  ;;  %s494_s26 = sand.u32 1, %s766_s17  }
 0x135   : > { %s495_s30 = scalar_lea.sflag [#allocation4], %s494_s26 }
 0x136   : > { %p620_p0 = pnand %p623_p4, %p868_p8 }
 0x138   : > { %p621_p1 = pneg %p620_p0 }
 0x13a   : > { %761 = dma.done.wait (%p621_p1), %s495_s30, 2048  }
 0x13b   : > { %763 = vsyncadd (%p621_p1), %s495_s30, 4294965248  ;;  %s19_s22 = sadd.s32 1, %s786_s22   ;;  %s1023_s17 = smov %s770_s18 }
 0x13c   : > { %p16_p2 = scmp.ge.s32.totalorder %s19_s22, 4   ;;  %s1024_s18 = smov %s774_s19 }
 0x13d   : > { %s1025_s19 = smov %s874_s29  ;;  %s1026_s20 = smov %s782_s21 }
 0x13e   : > { %s1027_s21 = smov %s1029_s24  ;;  %18 = sbr.rel (!%p16_p2) target bundleno = 6 (0x6), region = 86 }
 0x143   :  { %508 = vsyncpa [#allocation4], 1 }
 0x144   :  { %510 = vsyncpa [#allocation4 + $0x1], 1 }

</bundles_post_ra>
